<compile_context>
chip_gen: v5e
topology: v5e:2x2
jax: 0.10.0
libtpu: 0.0.40
codegen_flags: <defaults>
</compile_context>

<pallas_src>
import functools

import jax
import jax.numpy as jnp
from jax.experimental import pallas as pl
from jax.experimental.pallas import tpu as pltpu

_LANE = 128


def _cdiv(a: int, b: int) -> int:
    return -(-a // b)


def _dice_sums_kernel(pred_ref, gt_ref, inter_ref, union_ref, *,
                      use_sigmoid: bool, hw: int, tile_cols: int,
                      n_t_inner: int, needs_mask: bool):
    """Grid = (n_split, row_blocks, spatial_tiles_per_split).

    Each step reduces a (RB, T) tile to lane-dense (RB, min(T,128)) partials and
    accumulates them into the resident output blocks across the last
    ("arbitrary") grid axis.
    """
    s = pl.program_id(0)          # spatial split shard (megacore)
    t = pl.program_id(2)          # spatial tile within shard (reduction axis)

    # First global column covered by this (logical) tile.
    col0 = (s * n_t_inner + t) * tile_cols

    @pl.when(t == 0)
    def _():
        inter_ref[...] = jnp.zeros_like(inter_ref)
        union_ref[...] = jnp.zeros_like(union_ref)

    def load(mask_tail):
        p = pred_ref[...].astype(jnp.float32)
        if use_sigmoid:
            p = jax.nn.sigmoid(p)
        g = gt_ref[...].astype(jnp.float32)   # mirrors gt.float(); gt may be int8
        if mask_tail:
            # Zero out lanes beyond the real spatial extent (partial tail tile
            # or fully-overhanging tile of the split shard).  Masking after the
            # sigmoid keeps padded lanes exactly neutral for both sums.
            col = col0 + jax.lax.broadcasted_iota(jnp.int32, p.shape, 1)
            valid = col < hw
            p = jnp.where(valid, p, 0.0)
            g = jnp.where(valid, g, 0.0)
        return p, g

    def accumulate(p, g):
        prod = p * g
        tot = p + g
        # Lane-aligned pairwise folding (T is min(T,128)*2^k by construction):
        # ~1 VALU add per element per accumulator, no cross-lane (XLU) work,
        # no reshape/relayout.  Result is lane-dense (RB, min(T,128)).
        w = tile_cols
        while w > _LANE:
            h = w // 2
            prod = prod[:, :h] + prod[:, h:w]
            tot = tot[:, :h] + tot[:, h:w]
            w = h
        inter_ref[...] += prod[None, :, :]
        union_ref[...] += tot[None, :, :]

    if needs_mask:
        is_tail = col0 + tile_cols > hw       # only tail/overhang tiles mask

        @pl.when(jnp.logical_not(is_tail))
        def _():
            accumulate(*load(mask_tail=False))

        @pl.when(is_tail)
        def _():
            accumulate(*load(mask_tail=True))
    else:
        accumulate(*load(mask_tail=False))


def dice_loss(
    pred: jax.Array,
    gt: jax.Array,
    *,
    sigmoid: bool = False,
    target_block_bytes: int = 10 * 1024 * 1024,  # combined pred+gt bytes / step
) -> jax.Array:
    """Pallas DiceLoss forward. pred/gt are NCHW; returns a float32 scalar.

    pred may be float32 or bfloat16 (bf16 halves its HBM traffic); gt may be a
    narrow integer mask (e.g. int8).  Accumulation is always float32.
    """
    B, C, H, W = pred.shape
    assert gt.shape == (B, C, H, W)

    R = B * C
    HW = H * W

    # Row block: full R unless R is a multiple of 32 (native int8 sublane tile),
    # in which case block by 32 so the row axis itself can be sharded across
    # TensorCores on v7x.
    RB = 32 if (R % 32 == 0 and R > 32) else R
    row_blocks = R // RB

    # Spatial tile: dtype-aware sizing.  T = min(T,128)*2^k columns so the
    # in-kernel pairwise folding stays lane-aligned, capped at HW and at the
    # target combined block size.
    bytes_per_col = (pred.dtype.itemsize + gt.dtype.itemsize) * RB
    target_cols = max(_LANE, target_block_bytes // bytes_per_col)
    if HW <= _LANE:
        T = HW                                   # full-dim lane block
    else:
        T = _LANE
        while T * 2 <= min(target_cols, HW):
            T *= 2
    if T > _LANE:
        g128 = T // _LANE
        assert T % _LANE == 0 and (g128 & (g128 - 1)) == 0

    n_t = _cdiv(HW, T)
    # Megacore: if there is only one row block, split the spatial tiles across
    # a leading parallel axis of size 2 so both v7x TensorCores get work
    # (no-op on single-core v5e/v6e).
    n_split = 2 if (row_blocks == 1 and n_t >= 2) else 1
    n_t_inner = _cdiv(n_t, n_split)
    overhang = (n_split * n_t_inner) != n_t
    needs_mask = (HW % T != 0) or overhang
    LW = min(T, _LANE)                           # lane width of the accumulators

    pred2 = pred.reshape(R, HW)   # free reshape for contiguous NCHW
    gt2 = gt.reshape(R, HW)       # keep gt in its narrow input dtype

    if overhang:
        def spatial_block(s, t):
            # Clamp the DMA to a real block; the kernel masks it to zero.
            return jnp.minimum(s * n_t_inner + t, n_t - 1)
    else:
        def spatial_block(s, t):
            return s * n_t_inner + t

    def in_index_map(s, r, t):
        return (r, spatial_block(s, t))

    kernel = functools.partial(
        _dice_sums_kernel, use_sigmoid=sigmoid, hw=HW, tile_cols=T,
        n_t_inner=n_t_inner, needs_mask=needs_mask)

    out_spec = pl.BlockSpec((1, RB, LW), lambda s, r, t: (s, r, 0))

    inter, union = pl.pallas_call(
        kernel,
        out_shape=(
            jax.ShapeDtypeStruct((n_split, R, LW), jnp.float32),
            jax.ShapeDtypeStruct((n_split, R, LW), jnp.float32),
        ),
        grid_spec=pltpu.PrefetchScalarGridSpec(
            num_scalar_prefetch=0,
            grid=(n_split, row_blocks, n_t_inner),
            in_specs=[
                pl.BlockSpec((RB, T), in_index_map),
                pl.BlockSpec((RB, T), in_index_map),
            ],
            out_specs=(out_spec, out_spec),
        ),
        compiler_params=pltpu.CompilerParams(
            # split / row axes are independent per output block -> parallel
            # (sharded across TCs on v7x); spatial axis accumulates into the
            # resident output blocks -> arbitrary (and last, by convention).
            dimension_semantics=("parallel", "parallel", "arbitrary"),
            # Big, double-buffered input blocks (~2 x 10 MiB) need more than the
            # 16/32 MiB scoped-VMEM defaults; 48 MiB is legal on v5e/v6e/v7x.
            vmem_limit_bytes=48 * 1024 * 1024,
        ),
    )(pred2, gt2)

    # Tiny epilogue in plain JAX: fold split shards + lanes, combine over batch,
    # per-class dice, mean over classes (matches the PyTorch loop exactly).
    inter_c = inter.sum(axis=(0, 2)).reshape(B, C).sum(axis=0)
    union_c = union.sum(axis=(0, 2)).reshape(B, C).sum(axis=0)
    per_class = 1.0 - 2.0 * inter_c / (union_c + jnp.float32(1e-8))
    return jnp.mean(per_class)


def _reference_dice_loss(pred, gt, *, sigmoid: bool = False):
    """Pure-JAX reference mirroring the PyTorch module (for sanity checking)."""
    p = jax.nn.sigmoid(pred) if sigmoid else pred
    g = gt.astype(jnp.float32)
    total = 0.0
    for c in range(pred.shape[1]):
        inter = jnp.sum(p[:, c] * g[:, c])
        union = jnp.sum(p[:, c] + g[:, c]) + 1e-8
        total += 1.0 - 2.0 * inter / union
    return total / pred.shape[1]


if __name__ == "__main__":
    key = jax.random.PRNGKey(0)
    k1, k2, k3, k4 = jax.random.split(key, 4)

    # Case 1: B=2, C=4, 16x16 -> HW=256 divides the tile exactly (no masking).
    B, C, H, W = 2, 4, 16, 16
    pred = jax.random.uniform(k1, (B, C, H, W), dtype=jnp.float32)
    gt = jax.random.bernoulli(k2, 0.5, (B, C, H, W)).astype(jnp.int8)

    loss = dice_loss(pred, gt, sigmoid=False)
    jax.block_until_ready(loss)
    ref = _reference_dice_loss(pred, gt, sigmoid=False)
    assert jnp.allclose(loss, ref, atol=1e-5, rtol=1e-5), (loss, ref)

    loss_sig = dice_loss(pred, gt, sigmoid=True)
    jax.block_until_ready(loss_sig)
    ref_sig = _reference_dice_loss(pred, gt, sigmoid=True)
    assert jnp.allclose(loss_sig, ref_sig, atol=1e-5, rtol=1e-5), (loss_sig, ref_sig)

    # Case 2: B=1, C=3, 20x20 -> HW=400: exercises the in-kernel tail masking
    # (400 % 256 != 0) and the 2-way spatial split (single row block).
    B2, C2, H2, W2 = 1, 3, 20, 20
    pred2 = jax.random.normal(k3, (B2, C2, H2, W2), dtype=jnp.float32)
    gt2 = jax.random.bernoulli(k4, 0.3, (B2, C2, H2, W2)).astype(jnp.int8)

    loss2 = dice_loss(pred2, gt2, sigmoid=True)
    jax.block_until_ready(loss2)
    ref2 = _reference_dice_loss(pred2, gt2, sigmoid=True)
    assert jnp.allclose(loss2, ref2, atol=1e-5, rtol=1e-5), (loss2, ref2)

    print("KERNEL_OK")
</pallas_src>

<mosaic_0001>
module attributes {stable_mosaic.version = 11 : i64} {
  func.func @_dice_sums_kernel(%arg0: i32, %arg1: i32, %arg2: i32, %arg3: memref<8x256xf32, #tpu.memory_space<vmem>>, %arg4: memref<8x256xi8, #tpu.memory_space<vmem>>, %arg5: memref<1x8x128xf32, #tpu.memory_space<vmem>>, %arg6: memref<1x8x128xf32, #tpu.memory_space<vmem>>) attributes {dimension_semantics = [#tpu.dimension_semantics<parallel>, #tpu.dimension_semantics<parallel>, #tpu.dimension_semantics<arbitrary>], iteration_bounds = array<i64: 1, 1, 1>, scalar_prefetch = 0 : i64, scratch_operands = 0 : i64, tpu.core_type = #tpu.core_type<tc>, window_params = [{transform_indices = @transform_0, window_bounds = array<i64: 8, 256>}, {transform_indices = @transform_1, window_bounds = array<i64: 8, 256>}, {transform_indices = @transform_2, window_bounds = array<i64: 1, 8, 128>}, {transform_indices = @transform_3, window_bounds = array<i64: 1, 8, 128>}]} {
    %c0_i32 = arith.constant 0 : i32
    %0 = arith.cmpi eq, %arg2, %c0_i32 : i32
    %1 = arith.extui %0 : i1 to i32
    %c0_i32_0 = arith.constant 0 : i32
    %2 = arith.cmpi ne, %1, %c0_i32_0 : i32
    scf.if %2 {
      %cst = arith.constant 0.000000e+00 : f32
      %22 = vector.broadcast %cst : f32 to vector<1x8x128xf32>
      %c0_16 = arith.constant 0 : index
      %c0_17 = arith.constant 0 : index
      %c0_18 = arith.constant 0 : index
      %23 = vector.load %arg5[%c0_16, %c0_17, %c0_18] : memref<1x8x128xf32, #tpu.memory_space<vmem>>, vector<1x8x128xf32>
      tpu.vector_store %arg5[%c0_16, %c0_17, %c0_18], %22 {strides = array<i32>} : memref<1x8x128xf32, #tpu.memory_space<vmem>>, vector<1x8x128xf32>,
      %cst_19 = arith.constant 0.000000e+00 : f32
      %24 = vector.broadcast %cst_19 : f32 to vector<1x8x128xf32>
      %c0_20 = arith.constant 0 : index
      %c0_21 = arith.constant 0 : index
      %c0_22 = arith.constant 0 : index
      %25 = vector.load %arg6[%c0_20, %c0_21, %c0_22] : memref<1x8x128xf32, #tpu.memory_space<vmem>>, vector<1x8x128xf32>
      tpu.vector_store %arg6[%c0_20, %c0_21, %c0_22], %24 {strides = array<i32>} : memref<1x8x128xf32, #tpu.memory_space<vmem>>, vector<1x8x128xf32>,
    } else {
    }
    %c0 = arith.constant 0 : index
    %c0_1 = arith.constant 0 : index
    %3 = vector.load %arg3[%c0, %c0_1] : memref<8x256xf32, #tpu.memory_space<vmem>>, vector<8x256xf32>
    %c0_2 = arith.constant 0 : index
    %c0_3 = arith.constant 0 : index
    %4 = vector.load %arg4[%c0_2, %c0_3] : memref<8x256xi8, #tpu.memory_space<vmem>>, vector<8x256xi8>
    %5 = arith.sitofp %4 : vector<8x256xi8> to vector<8x256xf32>
    %6 = arith.mulf %3, %5 : vector<8x256xf32>
    %7 = arith.addf %3, %5 : vector<8x256xf32>
    %8 = vector.extract_strided_slice %6 {offsets = [0, 0], sizes = [8, 128], strides = [1, 1]} : vector<8x256xf32> to vector<8x128xf32>
    %9 = vector.extract_strided_slice %6 {offsets = [0, 128], sizes = [8, 128], strides = [1, 1]} : vector<8x256xf32> to vector<8x128xf32>
    %10 = arith.addf %8, %9 : vector<8x128xf32>
    %11 = vector.extract_strided_slice %7 {offsets = [0, 0], sizes = [8, 128], strides = [1, 1]} : vector<8x256xf32> to vector<8x128xf32>
    %12 = vector.extract_strided_slice %7 {offsets = [0, 128], sizes = [8, 128], strides = [1, 1]} : vector<8x256xf32> to vector<8x128xf32>
    %13 = arith.addf %11, %12 : vector<8x128xf32>
    %c0_4 = arith.constant 0 : index
    %c0_5 = arith.constant 0 : index
    %c0_6 = arith.constant 0 : index
    %14 = vector.load %arg5[%c0_4, %c0_5, %c0_6] : memref<1x8x128xf32, #tpu.memory_space<vmem>>, vector<1x8x128xf32>
    %15 = vector.shape_cast %10 : vector<8x128xf32> to vector<1x8x128xf32>
    %16 = arith.addf %14, %15 : vector<1x8x128xf32>
    %c0_7 = arith.constant 0 : index
    %c0_8 = arith.constant 0 : index
    %c0_9 = arith.constant 0 : index
    %17 = vector.load %arg5[%c0_7, %c0_8, %c0_9] : memref<1x8x128xf32, #tpu.memory_space<vmem>>, vector<1x8x128xf32>
    tpu.vector_store %arg5[%c0_7, %c0_8, %c0_9], %16 {strides = array<i32>} : memref<1x8x128xf32, #tpu.memory_space<vmem>>, vector<1x8x128xf32>,
    %c0_10 = arith.constant 0 : index
    %c0_11 = arith.constant 0 : index
    %c0_12 = arith.constant 0 : index
    %18 = vector.load %arg6[%c0_10, %c0_11, %c0_12] : memref<1x8x128xf32, #tpu.memory_space<vmem>>, vector<1x8x128xf32>
    %19 = vector.shape_cast %13 : vector<8x128xf32> to vector<1x8x128xf32>
    %20 = arith.addf %18, %19 : vector<1x8x128xf32>
    %c0_13 = arith.constant 0 : index
    %c0_14 = arith.constant 0 : index
    %c0_15 = arith.constant 0 : index
    %21 = vector.load %arg6[%c0_13, %c0_14, %c0_15] : memref<1x8x128xf32, #tpu.memory_space<vmem>>, vector<1x8x128xf32>
    tpu.vector_store %arg6[%c0_13, %c0_14, %c0_15], %20 {strides = array<i32>} : memref<1x8x128xf32, #tpu.memory_space<vmem>>, vector<1x8x128xf32>,
    return
  }
  func.func @transform_0(%arg0: i32, %arg1: i32, %arg2: i32) -> (i32, i32) {
    %c1_i32 = arith.constant 1 : i32
    %0 = arith.muli %arg0, %c1_i32 : i32
    %1 = arith.addi %0, %arg2 : i32
    %c0_i32 = arith.constant 0 : i32
    return %arg1, %1 : i32, i32
  }
  func.func @transform_1(%arg0: i32, %arg1: i32, %arg2: i32) -> (i32, i32) {
    %c1_i32 = arith.constant 1 : i32
    %0 = arith.muli %arg0, %c1_i32 : i32
    %1 = arith.addi %0, %arg2 : i32
    %c0_i32 = arith.constant 0 : i32
    return %arg1, %1 : i32, i32
  }
  func.func @transform_2(%arg0: i32, %arg1: i32, %arg2: i32) -> (i32, i32, i32) {
    %c0_i32 = arith.constant 0 : i32
    %c0_i32_0 = arith.constant 0 : i32
    return %arg0, %arg1, %c0_i32 : i32, i32, i32
  }
  func.func @transform_3(%arg0: i32, %arg1: i32, %arg2: i32) -> (i32, i32, i32) {
    %c0_i32 = arith.constant 0 : i32
    %c0_i32_0 = arith.constant 0 : i32
    return %arg0, %arg1, %c0_i32 : i32, i32, i32
  }
}

</mosaic_0001>

<bundles_post_ra>
// kernel: tpu_custom_call.1
= control target key start
LH: loop header
LB: loop body
LE: loop exit
PB: predicated region body
PF: predicated region fallthrough
CT: control target
= control target key end

     0   :  { %9 = vsyncpa [#allocation3], 0  ;;  %s259_s0 = inlined_call_operand.hbm [shape: f32[8,256], index: 0, kind: input, shape index: {}]   ;;  %s260_s1 = inlined_call_operand.hbm [shape: s8[8,256], index: 1, kind: input, shape index: {}]   ;;  %s261_s2 = inlined_call_operand.hbm [shape: f32[1,8,128], index: 2, kind: output, shape index: {0}]   ;;  %s262_s3 = inlined_call_operand.hbm [shape: f32[1,8,128], index: 3, kind: output, shape index: {1}]  }
   0x1   :  { %10 = vsyncpa [#allocation6], 0 }
   0x2   :  { %11 = vsyncpa [#allocation4], 0 }
   0x3   :  { %12 = vsyncpa [#allocation9], 0  ;;  %s22_s14 = sshll.u32 %s259_s0, 4  ;;  %s223_s15 = smov [#allocation2]   ;;  %s23_s14 = int_to_ptr.hbm [resolvable:$true] %s22_s14 }
   0x4   :  { %s24_s16 = sshll.u32 %s223_s15, 4  ;;  %s37_s19 = sshll.u32 %s260_s1, 4  ;;  %s25_s16 = int_to_ptr.vmem [resolvable:$true] %s24_s16  ;;  %s38_s19 = int_to_ptr.hbm [resolvable:$true] %s37_s19 }
   0x5   :  { %27 = dma.hbm_to_vmem [thread:$0]  %s23_s14, 256, %s25_s16, [#allocation3]  }
   0x6   :  { %s224_s20 = smov [#allocation5]  }
   0x7   :  { %s39_s21 = sshll.u32 %s224_s20, 4  ;;  %s40_s21 = int_to_ptr.vmem [resolvable:$true] %s39_s21 }
   0x8   :  { %42 = dma.hbm_to_vmem [thread:$0]  %s38_s19, 64, %s40_s21, [#allocation6]  }
   0x9   :  { %215 = dma.done.wait [#allocation3], 256  }
   0xa   :  { %216 = vsyncadd [#allocation3], 4294967040 }
   0xb   :  { %217 = dma.done.wait [#allocation6], 64  }
   0xc   :  { %218 = vsyncadd [#allocation6], 4294967232  ;;  %v63_v0 = vld [vmem:[#allocation5] sm:$0xf]  ;;  %v61_v3 = vld [vmem:[#allocation2] sm:$0xff]  ;;  %s225_s0 = smov [#allocation7]  }
   0xd   :  { %v64_v1 = vunpack.c.0.s8 %v63_v0  ;;  %v65_v2 = vunpack.c.1.s8 %v63_v0  ;;  %v62_v4 = vld [vmem:[#allocation2 + $0x8] sm:$0xff]  ;;  %s85_s1 = sshll.u32 %s225_s0, 4  ;;  %s87_s24 = sshll.u32 %s261_s2, 4  ;;  %s86_s1 = int_to_ptr.vmem [resolvable:$true] %s85_s1  ;;  %s88_s24 = int_to_ptr.hbm [resolvable:$true] %s87_s24 }
   0xe   :  { %s226_s25 = smov [#allocation8]   ;;  %s98_s29 = sshll.u32 %s262_s3, 4  ;;  %s99_s29 = int_to_ptr.hbm [resolvable:$true] %s98_s29 }
   0xf   :  { %v66_v5 = vcvt.s32.f32 %v64_v1  ;;  %v67_v6 = vcvt.s32.f32 %v65_v2  ;;  %s96_s26 = sshll.u32 %s226_s25, 4  ;;  %s97_s26 = int_to_ptr.vmem [resolvable:$true] %s96_s26 }
  0x11   :  { %v68_v7 = vmul.f32 %v66_v5, %v61_v3  ;;  %v69_v8 = vmul.f32 %v67_v6, %v62_v4  ;;  %v70_v9 = vadd.f32 %v66_v5, %v61_v3  ;;  %v71_v10 = vadd.f32 %v67_v6, %v62_v4 }
  0x13   :  { %v72_v11 = vadd.f32 %v69_v8, %v68_v7  ;;  %v73_v12 = vadd.f32 %v71_v10, %v70_v9 }
  0x15   :  { %76 = vst [vmem:[#allocation7] sm:$0xff] %v72_v11 }
  0x16   :  { %79 = vst [vmem:[#allocation8] sm:$0xff] %v73_v12  ;;  %90 = dma.vmem_to_hbm [thread:$0]  %s86_s1, 128, %s88_s24, [#allocation4]  }
  0x17   :  { %101 = dma.vmem_to_hbm [thread:$0]  %s97_s26, 128, %s99_s29, [#allocation9]  }
  0x18   :  { %219 = dma.done.wait [#allocation4], 128  }
  0x19   :  { %220 = vsyncadd [#allocation4], 4294967168 }
  0x1a   :  { %221 = dma.done.wait [#allocation9], 128  }
  0x1b   :  { %222 = vsyncadd [#allocation9], 4294967168 }
  0x1c   :  { %110 = vsyncpa [#allocation3], 1 }
  0x1d   :  { %111 = vsyncpa [#allocation6], 1 }
  0x1e   :  { %112 = vsyncpa [#allocation4], 1 }
  0x1f   :  { %113 = vsyncpa [#allocation9], 1 }

</bundles_post_ra>
